<compile_context>
chip_gen: v7x
topology: tpu7x:2x2x1
jax: 0.10.0
libtpu: 0.0.40
codegen_flags: <defaults>
</compile_context>

<pallas_src>
import jax
import jax.numpy as jnp
from jax.experimental import pallas as pl
from jax.experimental.pallas import tpu as pltpu


def conv1x1_kernel(x_ref, w_ref, b_ref, o_ref):
    # x_ref: (Cin, tp)   activations for one image, pixels on the lane axis
    # w_ref: (Cout, Cin) 1x1 conv weight (constant index_map -> stays resident)
    # b_ref: (Cout, 1)   bias
    # o_ref: (Cout, tp)  conv output, pixels on the lane axis (lane-dense store)
    acc = jnp.dot(w_ref[...], x_ref[...],
                  preferred_element_type=jnp.float32,
                  precision=jax.lax.Precision.HIGHEST)
    o_ref[...] = (acc + b_ref[...]).astype(o_ref.dtype)


def conv1x1_pallas(x, weight, bias, *, tp=32768):
    """x: (N, Cin, P) f32; weight: (Cout, Cin) f32; bias: (Cout,) f32 -> (N, Cout, P)."""
    N, Cin, P = x.shape
    Cout = weight.shape[0]

    # Lane-dense pixel tile: multiple of 128, no larger than P rounded up to 128.
    p_full = pl.cdiv(P, 128) * 128
    tp = max(128, min(int(tp), p_full))
    tp = pl.cdiv(tp, 128) * 128
    # v7x has 2 TensorCores sharing the "parallel" grid axes: if a single image with a
    # single pixel tile would produce a 1-step grid, split the pixel axis in two.
    if N == 1 and pl.cdiv(P, tp) < 2 and P > 128:
        tp = pl.cdiv(pl.cdiv(P, 2), 128) * 128

    # Partial last block is fine: OOB lanes are computed on garbage and dropped by the
    # masked blocked store (no lane reductions / manual DMAs depend on them).
    grid = (N, pl.cdiv(P, tp))

    # Explicit VMEM budget (review item): double-buffered x and out tiles (Cout padded
    # to a sublane multiple) + weight/bias + slack.  ~25 MiB at tp=32768 -> safe on
    # v5e (128 MiB phys), v6e (128 MiB) and v7x (64 MiB per TC).
    cout_pad = pl.cdiv(Cout, 8) * 8
    vmem_bytes = 2 * (Cin + cout_pad) * tp * 4 + (4 << 20)
    vmem_bytes = max(int(vmem_bytes), 16 << 20)

    return pl.pallas_call(
        conv1x1_kernel,
        out_shape=jax.ShapeDtypeStruct((N, Cout, P), jnp.float32),
        grid_spec=pltpu.PrefetchScalarGridSpec(
            num_scalar_prefetch=0,
            grid=grid,
            in_specs=[
                pl.BlockSpec((None, Cin, tp), lambda n, p: (n, 0, p)),
                pl.BlockSpec((Cout, Cin), lambda n, p: (0, 0)),
                pl.BlockSpec((Cout, 1), lambda n, p: (0, 0)),
            ],
            out_specs=pl.BlockSpec((None, Cout, tp), lambda n, p: (n, 0, p)),
        ),
        compiler_params=pltpu.CompilerParams(
            dimension_semantics=("parallel", "parallel"),
            vmem_limit_bytes=vmem_bytes,
        ),
    )(x, weight, bias.reshape(Cout, 1))


def upsample_forward(inputs, weight, bias, ratio, *, tp=32768):
    """inputs: (N, 64, H, W) f32 NCHW; weight: (Cout, Cin); bias: (Cout,).

    Returns (N, 3, H*ratio, W*ratio), matching Conv2d(64, r*r*3, 1) + PixelShuffle(r).
    """
    N, Cin, H, W = inputs.shape
    r = ratio
    P = H * W

    # Free reshape: NCHW is contiguous, pixels land on the last (lane) axis.
    x = inputs.reshape(N, Cin, P)

    # Hot path: 1x1 conv as (Cout, Cin) @ (Cin, pixels) matmul in Pallas.
    y = conv1x1_pallas(x, weight, bias, tp=tp)  # (N, Cout, P) == NCHW conv output

    # PixelShuffle(r): out[n, c, h*r+i, w*r+j] = y[n, c*r*r + i*r + j, h, w]
    # TODO(synk): fold this pass into the Pallas call (see header) to drop ~24% of
    # the total HBM traffic.
    y = y.reshape(N, 3, r, r, H, W)
    y = jnp.transpose(y, (0, 1, 4, 2, 5, 3))  # (N, 3, H, r, W, r)
    return y.reshape(N, 3, H * r, W * r)


def upsample_reference(inputs, weight, bias, ratio):
    """Pure-JAX reference for correctness check (f32 accumulation forced)."""
    N, Cin, H, W = inputs.shape
    y = jnp.einsum("nchw,kc->nkhw", inputs, weight,
                   precision=jax.lax.Precision.HIGHEST)
    y = y + bias.reshape(1, -1, 1, 1)
    r = ratio
    y = y.reshape(N, 3, r, r, H, W)
    y = jnp.transpose(y, (0, 1, 4, 2, 5, 3))
    return y.reshape(N, 3, H * r, W * r)


if __name__ == "__main__":
    key = jax.random.PRNGKey(0)
    k_x, k_w, k_b = jax.random.split(key, 3)

    N, Cin, H, W = 2, 64, 16, 16
    ratio = 2
    Cout = ratio * ratio * 3

    # Deterministic synthetic parameters:
    # Conv2d(64, r*r*3, 1x1): weight (Cout, Cin, 1, 1), bias (Cout,).
    fan_in = Cin
    w_oihw = jax.random.uniform(k_w, (Cout, Cin, 1, 1), jnp.float32,
                                minval=-1.0, maxval=1.0) / jnp.sqrt(fan_in)
    bias = jax.random.uniform(k_b, (Cout,), jnp.float32,
                              minval=-1.0, maxval=1.0) / jnp.sqrt(fan_in)
    weight = w_oihw[:, :, 0, 0]  # (Cout, Cin) -- natural PyTorch orientation

    x = jax.random.normal(k_x, (N, Cin, H, W), jnp.float32)

    out = upsample_forward(x, weight, bias, ratio)
    out = jax.block_until_ready(out)

    ref = upsample_reference(x, weight, bias, ratio)
    assert out.shape == (N, 3, H * ratio, W * ratio), out.shape
    assert jnp.allclose(out, ref, atol=1e-5, rtol=1e-5), \
        float(jnp.max(jnp.abs(out - ref)))

    print("KERNEL_OK")
</pallas_src>

<mosaic_0001>
module attributes {stable_mosaic.version = 11 : i64} {
  func.func @conv1x1_kernel(%arg0: i32, %arg1: i32, %arg2: memref<1x64x256xf32, #tpu.memory_space<vmem>>, %arg3: memref<12x64xf32, #tpu.memory_space<vmem>>, %arg4: memref<12x1xf32, #tpu.memory_space<vmem>>, %arg5: memref<1x12x256xf32, #tpu.memory_space<vmem>>) attributes {dimension_semantics = [#tpu.dimension_semantics<parallel>, #tpu.dimension_semantics<parallel>], iteration_bounds = array<i64: 2, 1>, scalar_prefetch = 0 : i64, scratch_operands = 0 : i64, tpu.core_type = #tpu.core_type<tc>, window_params = [{transform_indices = @transform_0, window_bounds = array<i64: 1, 64, 256>}, {pipeline_mode = #tpu.pipeline_mode<synchronous>, transform_indices = @transform_1, window_bounds = array<i64: 12, 64>}, {pipeline_mode = #tpu.pipeline_mode<synchronous>, transform_indices = @transform_2, window_bounds = array<i64: 12, 1>}, {transform_indices = @transform_3, window_bounds = array<i64: 1, 12, 256>}]} {
    %c0 = arith.constant 0 : index
    %c0_0 = arith.constant 0 : index
    %0 = vector.load %arg3[%c0, %c0_0] : memref<12x64xf32, #tpu.memory_space<vmem>>, vector<12x64xf32>
    %c0_1 = arith.constant 0 : index
    %c0_2 = arith.constant 0 : index
    %c0_3 = arith.constant 0 : index
    %1 = vector.load %arg2[%c0_1, %c0_2, %c0_3] : memref<1x64x256xf32, #tpu.memory_space<vmem>>, vector<1x64x256xf32>
    %2 = vector.shape_cast %1 : vector<1x64x256xf32> to vector<64x256xf32>
    %cst = arith.constant dense<0.000000e+00> : vector<12x256xf32>
    %3 = tpu.matmul %0, %2, %cst {dimension_numbers = #tpu.dot_dimension_numbers<[1], [0], [0], [1], [0, 0, 1, 1], [], []>, precision = #tpu.contract_precision<fp32>} : vector<12x64xf32>, vector<64x256xf32>, vector<12x256xf32> -> vector<12x256xf32>
    %c0_4 = arith.constant 0 : index
    %c0_5 = arith.constant 0 : index
    %4 = vector.load %arg4[%c0_4, %c0_5] : memref<12x1xf32, #tpu.memory_space<vmem>>, vector<12x1xf32>
    %5 = vector.broadcast %4 : vector<12x1xf32> to vector<12x256xf32>
    %6 = arith.addf %3, %5 : vector<12x256xf32>
    %c0_6 = arith.constant 0 : index
    %c0_7 = arith.constant 0 : index
    %c0_8 = arith.constant 0 : index
    %7 = vector.load %arg5[%c0_6, %c0_7, %c0_8] : memref<1x12x256xf32, #tpu.memory_space<vmem>>, vector<1x12x256xf32>
    %8 = vector.shape_cast %7 : vector<1x12x256xf32> to vector<12x256xf32>
    %9 = vector.shape_cast %6 : vector<12x256xf32> to vector<1x12x256xf32>
    tpu.vector_store %arg5[%c0_6, %c0_7, %c0_8], %9 {strides = array<i32>} : memref<1x12x256xf32, #tpu.memory_space<vmem>>, vector<1x12x256xf32>,
    return
  }
  func.func @transform_0(%arg0: i32, %arg1: i32) -> (i32, i32, i32) {
    %c0_i32 = arith.constant 0 : i32
    %c0_i32_0 = arith.constant 0 : i32
    return %arg0, %c0_i32, %arg1 : i32, i32, i32
  }
  func.func @transform_1(%arg0: i32, %arg1: i32) -> (i32, i32) {
    %c0_i32 = arith.constant 0 : i32
    %c0_i32_0 = arith.constant 0 : i32
    %c0_i32_1 = arith.constant 0 : i32
    return %c0_i32, %c0_i32_0 : i32, i32
  }
  func.func @transform_2(%arg0: i32, %arg1: i32) -> (i32, i32) {
    %c0_i32 = arith.constant 0 : i32
    %c0_i32_0 = arith.constant 0 : i32
    %c0_i32_1 = arith.constant 0 : i32
    return %c0_i32, %c0_i32_0 : i32, i32
  }
  func.func @transform_3(%arg0: i32, %arg1: i32) -> (i32, i32, i32) {
    %c0_i32 = arith.constant 0 : i32
    %c0_i32_0 = arith.constant 0 : i32
    return %arg0, %c0_i32, %arg1 : i32, i32, i32
  }
}

</mosaic_0001>

<bundles_post_ra>
// kernel: tpu_custom_call.1
= control target key start
LH: loop header
LB: loop body
LE: loop exit
PB: predicated region body
PF: predicated region fallthrough
CT: control target
= control target key end

     0   :  { %8 = vsyncpa [#allocation3], 0  ;;  %s1658_s0 = inlined_call_operand.hbm [shape: f32[2,64,256], index: 0, kind: input, shape index: {}]   ;;  %s1659_s1 = inlined_call_operand.vmem [shape: f32[12,64], index: 1, kind: input, shape index: {}]   ;;  %s1660_s2 = inlined_call_operand.vmem [shape: f32[12,1], index: 2, kind: input, shape index: {}]   ;;  %s1661_s3 = inlined_call_operand.vmem [shape: f32[2,12,256], index: 3, kind: output, shape index: {}]  }
   0x1   :  { %10 = vsyncpa [#allocation3 + $0x1], 0  ;;  %s1353_s12 = smov 0   ;;  %s1355_s13 = smov 0  }
   0x2   :  { %s1357_s14 = smov 0   ;;  %s1359_s15 = smov 0  }
   0x3   :  { %s1361_s16 = smov 0   ;;  %s1363_s17 = smov 0  }
   0x4 LB: > { %s1051_s18 = sadd.s32 4294967295, %s1326_s17   ;;  %s28_s19 = sadd.s32 1, %s1322_s16  ;;  %s1326_s17 = sphi %s1363_s17, %s16_s17   ;;  %s1322_s16 = sphi %s1361_s16, %s1669_s16   ;;  %s1318_s15 = sphi %s1359_s15, %s1668_s15   ;;  %s1314_s14 = sphi %s1357_s14, %s1667_s14   ;;  %s1310_s13 = sphi %s1355_s13, %s1666_s13   ;;  %s1306_s12 = sphi %s1353_s12, %s1665_s12  }
   0x5   : > { %p30_p0 = scmp.ge.s32.totalorder %s28_s19, 2  ;;  %s37_s20 = sadd.s32 1, %s1314_s14 }
   0x6   : > { %p44_p1 = scmp.ne.s32.totalorder %s1314_s14, %s1310_s13  ;;  %p45_p2 = scmp.eq.s32.totalorder %s1326_s17, 0 }
   0x7   : > { %s1671_s19 = smov (%p30_p0, %s28_s19), 0  ;;  %p50_p4 = scmp.ne.s32.totalorder %s1310_s13, %s1306_s12 }
   0x8   : > { %p1389_p3 = por %p45_p2, %p44_p1  ;;  %s32_s22 = ssub.s32 %s1322_s16, %s1671_s19 }
   0x9   : > { %p51_p5 = scmp.eq.s32.totalorder %s1051_s18, 0  ;;  %p35_p6 = scmp.eq.s32.totalorder %s32_s22, 0 }
   0xa   : > { %p1192_p8 = scmp.lt.s32.totalorder %s1326_s17, 2  ;;  %s150_s25 = sand.u32 1, %s1314_s14  }
   0xb   : > { %p1396_p7 = por %p51_p5, %p50_p4  ;;  %s1064_s26 = sshll.u32 %s1322_s16, 11 }
   0xc   : > { %s1402_s24 = scalar_select %p35_p6, %s1314_s14, %s37_s20  }
   0xd   : > { %s1055_s27 = sshll.u32 %s150_s25, 7  ;;  %s1409_s30 = scalar_lea.hbm %s1658_s0, %s1064_s26 }
   0xe   : > { %s154_s4 = scalar_lea.vmem [#allocation2], %s1055_s27  ;;  %p1413_p9 = pnand %p1192_p8, %p1389_p3 }
   0xf   : > { %s163_s5 = sshll.u32 %s154_s4, 4  ;;  %s1419_s7 = scalar_lea.sflag [#allocation3], %s150_s25  ;;  %s1417_s5 = int_to_ptr.vmem [resolvable:$true] %s163_s5 }
  0x10   : > { %s1246_s8 = scalar_lea.hbm %s1409_s30, 2048  ;;  %p1248_p11 = pneg %p1413_p9 }
  0x11   : > { %p1247_p10 = scmp.ne.s32.totalorder %s1409_s30, %s1246_s8  ;;  %s1251_s11 = scalar_lea.hbm %s1658_s0, 4096 }
  0x12   : > { %p1252_p0 = scmp.lt.u32.totalorder %s1409_s30, %s1658_s0  ;;  %p1253_p1 = scmp.lt.u32.totalorder %s1251_s11, %s1246_s8 }
  0x13   : > { %p1249_p12 = pnand %p1248_p11, %p1247_p10  ;;  %p1255_p3 = scmp.lt.u32.totalorder %s1246_s8, %s1409_s30 }
  0x14   : > { %p1254_p2 = por %p1253_p1, %p1252_p0 }
  0x15   : > { %p1250_p13 = pneg %p1249_p12 }
  0x16   : > { %p1256_p4 = por %p1255_p3, %p1254_p2 }
  0x18   : > { %p1257_p5 = pnand %p1256_p4, %p1250_p13 }
  0x1a   : > { %1260 = shalt.err (!%p1257_p5)
}
  0x1b   : > { %s1261_s20 = scalar_lea.vmem %s1417_s5, 2048  ;;  %s1328_s21 = smov [#allocation2]  }
  0x1c   : > { %p1262_p6 = scmp.ne.s32.totalorder %s1417_s5, %s1261_s20  ;;  %s1266_s22 = sshll.u32 %s1328_s21, 4  ;;  %s1267_s22 = int_to_ptr.vmem [resolvable:$false] %s1266_s22 }
  0x1d   : > { %s1268_s25 = scalar_lea.vmem %s1267_s22, 4096  ;;  %p1269_p12 = scmp.lt.s32.totalorder %s1417_s5, %s1267_s22 }
  0x1e   : > { %p1264_p8 = pnand %p1262_p6, %p1248_p11  ;;  %p1270_p0 = scmp.lt.s32.totalorder %s1268_s25, %s1261_s20 }
  0x20   : > { %p1265_p10 = pneg %p1264_p8  ;;  %p1271_p1 = por %p1270_p0, %p1269_p12 }
  0x22   : > { %p1272_p2 = pnand %p1271_p1, %p1265_p10 }
  0x24   : > { %1275 = shalt.err (!%p1272_p2)
}
  0x25   : > { %s1329_s26 = smov 256   ;;  %s1330_s27 = smov 16  }
  0x26   : > { %1191 = dma.hbm_to_vmem [thread:$0]  (!%p1413_p9), %s1409_s30, 2048, %s1417_s5, %s1419_s7, %s1329_s26, %s1329_s26, %s1330_s27  }
  0x27   : > { %p1058_p11 = scmp.ge.s32.totalorder %s1326_s17, 1  ;;  %p171_p13 = scmp.lt.s32.totalorder %s1326_s17, 3 }
  0x29   : > { %p172_p3 = pnand %p1058_p11, %p171_p13 }
  0x2a   : > { %s177_s28 = sand.u32 (!%p172_p3), 1, %s1310_s13  }
  0x2b   : > { %175 = sbr.rel (%p172_p3) target bundleno = 328 (0x148), region = 32  ;;  %s1059_s29 = sshll.u32 (!%p172_p3), %s177_s28, 7 }
  0x2c   : > { %s178_s4 = scalar_lea.sflag (!%p172_p3), [#allocation3], %s177_s28  ;;  %s1450_s8 = scalar_lea.vmem (!%p172_p3), [#allocation2], %s1059_s29 }
  0x32   : > { %1301 = dma.done.wait (%p1396_p7), %s178_s4, 2048  }
  0x33   : > { %1303 = vsyncadd (%p1396_p7), %s178_s4, 4294965248  ;;  %v1331_v0 = vmov 0.0   ;;  %v1332_v1 = vmov 0   ;;  %v222_v2 = vld [vmem:[%s1450_s8 + $0x8] sm:$0xff]  ;;  %v224_v3 = vld [vmem:[%s1450_s8 + $0x18] sm:$0xff]  ;;  %vm249_vm0 = vcmask 523264  }
  0x34   : > { %336 = vmatprep.mubr.f32.mxu1 %v1331_v0  ;;  %711 = vmatprep.mubr.f32.mxu0 %v1331_v0  ;;  %v221_v4 = vld [vmem:[%s1450_s8] sm:$0xff]  ;;  %v256_v5 = vand.u32 4294901760, %v222_v2  ;;  %v260_v6 = vand.u32 4294901760, %v224_v3  ;;  %v223_v7 = vld [vmem:[%s1450_s8 + $0x10] sm:$0xff]  ;;  %v226_v9 = vld [vmem:[%s1450_s8 + $0x28] sm:$0xff]  ;;  %p210_p7 = scmp.lt.s32.totalorder %s1318_s15, 1 }
  0x35   : > { %1245 = vset.pattern.permute.xlu0 %v1332_v1  ;;  %v258_v8 = vand.u32 4294901760, %v221_v4  ;;  %v228_v10 = vld [vmem:[%s1450_s8 + $0x38] sm:$0xff]  ;;  %v262_v11 = vand.u32 4294901760, %v223_v7  ;;  %v264_v12 = vand.u32 4294901760, %v226_v9  ;;  %v225_v14 = vld [vmem:[%s1450_s8 + $0x20] sm:$0xff]  ;;  %v227_v15 = vld [vmem:[%s1450_s8 + $0x30] sm:$0xff] }
  0x36   : > { %v268_v13 = vand.u32 4294901760, %v228_v10  ;;  %v230_v16 = vld [vmem:[%s1450_s8 + $0x48] sm:$0xff]  ;;  %v1467_v17 = vpack.c.bf16 %v260_v6, %v256_v5  ;;  %v1469_v18 = vsub.f32 %v222_v2, %v256_v5  ;;  %v1471_v19 = vsub.f32 %v224_v3, %v260_v6  ;;  %v232_v20 = vld [vmem:[%s1450_s8 + $0x58] sm:$0xff]  ;;  %v229_v21 = vld [vmem:[%s1450_s8 + $0x40] sm:$0xff]  ;;  %s1673_s15 = smov (!%p210_p7, %s1318_s15), 1 }
  0x37   : > { %v231_v22 = vld [vmem:[%s1450_s8 + $0x50] sm:$0xff]  ;;  %v1476_v23 = vpack.c.bf16 %v262_v11, %v258_v8  ;;  %v1478_v24 = vsub.f32 %v221_v4, %v258_v8  ;;  %v1480_v25 = vsub.f32 %v223_v7, %v262_v11  ;;  %v234_v27 = vld [vmem:[%s1450_s8 + $0x68] sm:$0xff]  ;;  %v236_v28 = vld [vmem:[%s1450_s8 + $0x78] sm:$0xff]  ;;  %v1488_v29 = vsub.f32 %v226_v9, %v264_v12  ;;  %s1065_s12 = sshll.u32 %s1673_s15, 5 }
  0x38   : > { %v1482_v26 = vpack.c.bf16 %v268_v13, %v264_v12  ;;  %1067 = vmatprep.subr.bf16.mxu1 %v1467_v17  ;;  %1115 = vmatprep.subr.bf16.mxu0 %v1467_v17  ;;  %v266_v30 = vand.u32 4294901760, %v225_v14  ;;  %v270_v31 = vand.u32 4294901760, %v227_v15  ;;  %v272_v32 = vand.u32 4294901760, %v230_v16  ;;  %v237_v33 = vld [vmem:[%s1660_s2] sm:$0xff]  ;;  %v235_v43 = vld [vmem:[%s1450_s8 + $0x70] sm:$0xff]  ;;  %s217_s21 = scalar_lea.vmem %s1661_s3, %s1065_s12 }
  0x39   : > { %1069 = vmatpush1.bf16.msra.mxu1 %v1476_v23  ;;  %1117 = vmatpush1.bf16.msra.mxu0 %v1476_v23  ;;  %v276_v34 = vand.u32 4294901760, %v232_v20  ;;  %v274_v35 = vand.u32 4294901760, %v229_v21  ;;  %v278_v36 = vand.u32 4294901760, %v231_v22  ;;  %v280_v37 = vand.u32 4294901760, %v234_v27  ;;  %v233_v42 = vld [vmem:[%s1450_s8 + $0x60] sm:$0xff] }
  0x3a   : > { %1071 = vmatprep.subr.bf16.mxu1 %v1482_v26  ;;  %v1496_v38 = vsub.f32 %v228_v10, %v268_v13  ;;  %1119 = vmatprep.subr.bf16.mxu0 %v1482_v26  ;;  %v1499_v39 = vpack.c.bf16 %v270_v31, %v266_v30  ;;  %v1501_v40 = vsub.f32 %v225_v14, %v266_v30  ;;  %v284_v41 = vand.u32 4294901760, %v236_v28  ;;  %v219_v48 = vld [vmem:[%s1659_s1] sm:$0xff]  ;;  %v238_v53 = vld [vmem:[%s1660_s2 + $0x8] sm:$0xf] }
  0x3b   : > { %v1505_v44 = vsub.f32 %v227_v15, %v270_v31  ;;  %v1507_v45 = vpack.c.bf16 %v276_v34, %v272_v32  ;;  %v1509_v46 = vsub.f32 %v230_v16, %v272_v32  ;;  %v1511_v47 = vsub.f32 %v232_v20, %v276_v34  ;;  %241 = vperm.xlu0 %1245, %v237_v33  }
  0x3c   : > { %v1516_v49 = vpack.c.bf16 %v278_v36, %v274_v35  ;;  %v1518_v50 = vsub.f32 %v229_v21, %v274_v35  ;;  %v1520_v51 = vsub.f32 %v231_v22, %v278_v36  ;;  %v1522_v52 = vpack.c.bf16 %v284_v41, %v280_v37 }
  0x3d   : > { %1073 = vmatpush1.bf16.msra.mxu1 %v1499_v39  ;;  %1121 = vmatpush1.bf16.msra.mxu0 %v1499_v39  ;;  %v1529_v54 = vsub.f32 %v234_v27, %v280_v37  ;;  %v282_v55 = vand.u32 4294901760, %v233_v42  ;;  %v286_v56 = vand.u32 4294901760, %v235_v43  ;;  %v361_v57 = vand.u32 4294901760, %v1469_v18 }
  0x3e   : > { %1075 = vmatprep.subr.bf16.mxu1 %v1507_v45  ;;  %1123 = vmatprep.subr.bf16.mxu0 %v1507_v45  ;;  %v373_v58 = vand.u32 4294901760, %v1471_v19  ;;  %v251_v59 = vsel %vm249_vm0, %v219_v48, 0  ;;  %v367_v60 = vand.u32 4294901760, %v1478_v24  ;;  %v379_v61 = vand.u32 4294901760, %v1480_v25 }
  0x3f   : > { %v1538_v62 = vsub.f32 %v236_v28, %v284_v41  ;;  %v1540_v63 = vpack.c.bf16 %v286_v56, %v282_v55  ;;  %v1542_v1 = vsub.f32 %v233_v42, %v282_v55  ;;  %v362_v2 = vsub.f32 %v1469_v18, %v361_v57  ;;  %246 = vperm.xlu0 %1245, %v238_v53  }
  0x40   : > { %v1545_v3 = vsub.f32 %v235_v43, %v286_v56  ;;  %v374_v4 = vsub.f32 %v1471_v19, %v373_v58  ;;  %v1548_v5 = vand.u32 4294901760, %v251_v59  ;;  %v368_v6 = vsub.f32 %v1478_v24, %v367_v60 }
  0x41   : > { %1077 = vmatpush1.bf16.msra.mxu1 %v1516_v49  ;;  %1125 = vmatpush1.bf16.msra.mxu0 %v1516_v49  ;;  %v363_v7 = vand.u32 4294901760, %v362_v2  ;;  %v1130_v8 = vpack.c.bf16 %v373_v58, %v361_v57  ;;  %v380_v9 = vsub.f32 %v1480_v25, %v379_v61  ;;  %v385_v10 = vand.u32 4294901760, %v1488_v29 }
  0x42   : > { %1079 = vmatprep.subr.bf16.mxu1 %v1522_v52  ;;  %1127 = vmatprep.subr.bf16.mxu0 %v1522_v52  ;;  %v375_v11 = vand.u32 4294901760, %v374_v4  ;;  %v1558_v12 = vsub.f32 %v251_v59, %v1548_v5  ;;  %v369_v13 = vand.u32 4294901760, %v368_v6  ;;  %v397_v14 = vand.u32 4294901760, %v1496_v38  ;;  %v220_v59 = vld [vmem:[%s1659_s1 + $0x8] sm:$0xf] }
  0x43   : > { %v381_v15 = vand.u32 4294901760, %v380_v9  ;;  %v386_v16 = vsub.f32 %v1488_v29, %v385_v10  ;;  %v391_v20 = vand.u32 4294901760, %v1501_v40  ;;  %v403_v21 = vand.u32 4294901760, %v1505_v44 }
  0x44   : > { %v1082_v22 = vpack.c.bf16 %v375_v11, %v363_v7  ;;  %v339_v27 = vand.u32 4294901760, %v1558_v12  ;;  %v1132_v28 = vpack.c.bf16 %v379_v61, %v367_v60  ;;  %v398_v30 = vsub.f32 %v1496_v38, %v397_v14 }
  0x45   : > { %1081 = vmatpush1.bf16.msra.mxu1 %v1540_v63  ;;  %1129 = vmatpush1.bf16.msra.mxu0 %v1540_v63  ;;  %v387_v31 = vand.u32 4294901760, %v386_v16  ;;  %v1134_v32 = vpack.c.bf16 %v397_v14, %v385_v10  ;;  %v392_v33 = vsub.f32 %v1501_v40, %v391_v20  ;;  %v404_v34 = vsub.f32 %v1505_v44, %v403_v21 }
  0x46   : > { %1083 = vmatprep.subr.bf16.mxu1 %v1082_v22  ;;  %1131 = vmatprep.subr.bf16.mxu0 %v1130_v8  ;;  %v340_v35 = vsub.f32 %v1558_v12, %v339_v27  ;;  %v1084_v36 = vpack.c.bf16 %v381_v15, %v369_v13  ;;  %v399_v37 = vand.u32 4294901760, %v398_v30  ;;  %v409_v41 = vand.u32 4294901760, %v1509_v46 }
  0x47   : > { %v393_v42 = vand.u32 4294901760, %v392_v33  ;;  %v405_v43 = vand.u32 4294901760, %v404_v34  ;;  %v421_v48 = vand.u32 4294901760, %v1511_v47  ;;  %v415_v53 = vand.u32 4294901760, %v1518_v50 }
  0x48   : > { %v341_v55 = vand.u32 4294901760, %v340_v35  ;;  %715 = vmatmul.mubr.f32.vlgmr.msra.gmra.mrb[0].mxu0 %v339_v27  ;;  %v1086_v56 = vpack.c.bf16 %v399_v37, %v387_v31  ;;  %v410_v57 = vsub.f32 %v1509_v46, %v409_v41  ;;  %v427_v58 = vand.u32 4294901760, %v1520_v51 }
  0x49   : > { %1133 = vmatpush1.bf16.msra.mxu0 %v1132_v28  ;;  %v1088_v60 = vpack.c.bf16 %v405_v43, %v393_v42  ;;  %v1136_v61 = vpack.c.bf16 %v403_v21, %v391_v20  ;;  %v422_v2 = vsub.f32 %v1511_v47, %v421_v48  ;;  %v416_v4 = vsub.f32 %v1518_v50, %v415_v53 }
  0x4a   : > { %342 = vmatmul.mubr.f32.vlgmr.msra.gmra.mrb[0].mxu1 %v341_v55  ;;  %1135 = vmatprep.subr.bf16.mxu0 %v1134_v32  ;;  %v411_v6 = vand.u32 4294901760, %v410_v57  ;;  %v1138_v7 = vpack.c.bf16 %v421_v48, %v409_v41  ;;  %v428_v8 = vsub.f32 %v1520_v51, %v427_v58  ;;  %v433_v9 = vand.u32 4294901760, %v1529_v54 }
  0x4b   : > { %1085 = vmatpush1.bf16.msra.mxu1 %v1084_v36  ;;  %v423_v10 = vand.u32 4294901760, %v422_v2  ;;  %v417_v11 = vand.u32 4294901760, %v416_v4  ;;  %347 = vmatprep.mubr.f32.mxu1 %v1331_v0  ;;  %v445_v13 = vand.u32 4294901760, %v1538_v62  ;;  %v254_v14 = vsel %vm249_vm0, %v220_v59, 0 }
  0x4c   : > { %1087 = vmatprep.subr.bf16.mxu1 %v1086_v56  ;;  %v429_v15 = vand.u32 4294901760, %v428_v8  ;;  %v434_v16 = vsub.f32 %v1529_v54, %v433_v9  ;;  %720 = vmatprep.mubr.f32.mxu0 %v1331_v0  ;;  %v1588_v20 = vand.u32 4294901760, %v254_v14  ;;  %v439_v21 = vand.u32 4294901760, %v1542_v1 }
  0x4d   : > { %1137 = vmatpush1.bf16.msra.mxu0 %v1136_v61  ;;  %v1090_v22 = vpack.c.bf16 %v423_v10, %v411_v6  ;;  %v1140_v27 = vpack.c.bf16 %v427_v58, %v415_v53  ;;  %v446_v28 = vsub.f32 %v1538_v62, %v445_v13  ;;  %v451_v30 = vand.u32 4294901760, %v1545_v3 }
  0x4e   : > { %1139 = vmatprep.subr.bf16.mxu0 %v1138_v7  ;;  %v435_v31 = vand.u32 4294901760, %v434_v16  ;;  %v1142_v32 = vpack.c.bf16 %v445_v13, %v433_v9  ;;  %v349_v33 = vsub.f32 %v254_v14, %v1588_v20  ;;  %v440_v34 = vsub.f32 %v1542_v1, %v439_v21 }
  0x4f   : > { %1089 = vmatpush1.bf16.msra.mxu1 %v1088_v60  ;;  %v1092_v35 = vpack.c.bf16 %v429_v15, %v417_v11  ;;  %v447_v36 = vand.u32 4294901760, %v446_v28  ;;  %v452_v37 = vsub.f32 %v1545_v3, %v451_v30  ;;  %v1144_v53 = vpack.c.bf16 %v451_v30, %v439_v21 }
  0x50   : > { %1091 = vmatprep.subr.bf16.mxu1 %v1090_v22  ;;  %v350_v41 = vand.u32 4294901760, %v349_v33  ;;  %v441_v42 = vand.u32 4294901760, %v440_v34  ;;  %v1098_v58 = vpack.c.bf16 %v1471_v19, %v1469_v18  ;;  %v1100_v59 = vpack.c.bf16 %v1480_v25, %v1478_v24 }
  0x51   : > { %1141 = vmatpush1.bf16.msra.mxu0 %v1140_v27  ;;  %v1094_v43 = vpack.c.bf16 %v447_v36, %v435_v31  ;;  %v453_v48 = vand.u32 4294901760, %v452_v37  ;;  %v1102_v60 = vpack.c.bf16 %v1496_v38, %v1488_v29  ;;  %v1106_v18 = vpack.c.bf16 %v1511_v47, %v1509_v46 }
  0x52   : > { %1143 = vmatprep.subr.bf16.mxu0 %v1142_v32  ;;  %v351_v55 = vsub.f32 %v349_v33, %v350_v41  ;;  %724 = vmatmul.mubr.f32.gmra.mrb[2].mxu0 %v350_v41  ;;  %v1108_v19 = vpack.c.bf16 %v1520_v51, %v1518_v50  ;;  %v1112_v24 = vpack.c.bf16 %v1545_v3, %v1542_v1 }
  0x53   : > { %1093 = vmatpush1.bf16.msra.mxu1 %v1092_v35  ;;  %v1096_v56 = vpack.c.bf16 %v453_v48, %v441_v42  ;;  %842 = vmatprep.mubr.f32.mxu0 %v1331_v0 }
  0x54   : > { %1095 = vmatprep.subr.bf16.mxu1 %v1094_v43  ;;  %v352_v57 = vand.u32 4294901760, %v351_v55 }
  0x55   : > { %1145 = vmatpush1.bf16.msra.mxu0 %v1144_v53 }
  0x56   : > { %353 = vmatmul.mubr.f32.gmra.mrb[2].mxu1 %v352_v57  ;;  %1147 = vmatprep.subr.bf16.mxu0 %v1467_v17  ;;  %v1104_v17 = vpack.c.bf16 %v1505_v44, %v1501_v40 }
  0x57   : > { %1097 = vmatpush1.bf16.msra.mxu1 %v1096_v56  ;;  %503 = vmatprep.mubr.f32.mxu1 %v1331_v0 }
  0x58   : > { %1099 = vmatprep.subr.bf16.mxu1 %v1098_v58  ;;  %844 = vmatmul.mubr.f32.vlgmr.msra.gmra.mrb[0].mxu0 %v1548_v5 }
  0x59   : > { %1149 = vmatpush1.bf16.msra.mxu0 %v1476_v23  ;;  %849 = vmatprep.mubr.f32.mxu0 %v1331_v0  ;;  %v1110_v23 = vpack.c.bf16 %v1538_v62, %v1529_v54 }
  0x5a   : > { %505 = vmatmul.mubr.f32.vlgmr.msra.gmra.mrb[0].mxu1 %v1548_v5  ;;  %1151 = vmatprep.subr.bf16.mxu0 %v1482_v26 }
  0x5b   : > { %1101 = vmatpush1.bf16.msra.mxu1 %v1100_v59  ;;  %510 = vmatprep.mubr.f32.mxu1 %v1331_v0 }
  0x5c   : > { %1103 = vmatprep.subr.bf16.mxu1 %v1102_v60  ;;  %851 = vmatmul.mubr.f32.gmra.mrb[2].mxu0 %v1588_v20 }
  0x5d   : > { %1153 = vmatpush1.bf16.msra.mxu0 %v1499_v39  ;;  %937 = vmatprep.mubr.f32.mxu0 %v1331_v0 }
  0x5e   : > { %1155 = vmatprep.subr.bf16.mxu0 %v1507_v45  ;;  %512 = vmatmul.mubr.f32.gmra.mrb[2].mxu1 %v1588_v20 }
  0x5f   : > { %1105 = vmatpush1.bf16.msra.mxu1 %v1104_v17  ;;  %614 = vmatprep.mubr.f32.mxu1 %v1331_v0 }
  0x60   : > { %1107 = vmatprep.subr.bf16.mxu1 %v1106_v18 }
  0x61   : > { %1157 = vmatpush1.bf16.msra.mxu0 %v1516_v49 }
  0x62   : > { %1159 = vmatprep.subr.bf16.mxu0 %v1522_v52 }
  0x63   : > { %1109 = vmatpush1.bf16.msra.mxu1 %v1108_v19 }
  0x64   : > { %1111 = vmatprep.subr.bf16.mxu1 %v1110_v23 }
  0x65   : > { %1161 = vmatpush1.bf16.msra.mxu0 %v1540_v63 }
  0x67   : > { %1113 = vmatpush1.bf16.msra.mxu1 %v1112_v24 }
  0x68   : > { %939 = vmatmul.mubr.f32.vlgmr.msra.gmra.mrb[0].mxu0 %v1548_v5 }
  0x69   : > { %944 = vmatprep.mubr.f32.mxu0 %v1331_v0 }
  0x6a   : > { %617 = vmatmul.mubr.f32.vlgmr.msra.gmra.mrb[0].mxu1 %v1558_v12 }
  0x6b   : > { %622 = vmatprep.mubr.f32.mxu1 %v1331_v0 }
  0x6c   : > { %946 = vmatmul.mubr.f32.gmra.mrb[2].mxu0 %v1588_v20 }
  0x6e   : > { %625 = vmatmul.mubr.f32.gmra.mrb[2].mxu1 %v349_v33 }
  0xba   : > { %v242_v25 = vpop.permute.xlu0 %241 }
  0xbe   : > { %v247_v47 = vpop.permute.xlu0 %246 }
 0x13b   : > { %v940_v26 = vpop.f32.mrb[0].mxu0 }
 0x13c   : > { %v942_v29 = vpop.f32.mrb[1].mxu0 }
 0x13d   : > { %v618_v38 = vpop.f32.mrb[0].mxu1 }
 0x13e   : > { %v1162_v39 = vadd.f32 %v618_v38, %v242_v25  ;;  %v620_v40 = vpop.f32.mrb[1].mxu1 }
 0x13f   : > { %v1164_v44 = vadd.f32 %v620_v40, %v242_v25  ;;  %v947_v45 = vpop.f32.mrb[2].mxu0 }
 0x140   : > { %v1163_v46 = vadd.f32 %v1162_v39, %v940_v26  ;;  %v949_v0 = vpop.f32.mrb[3].mxu0 }
 0x141   : > { %v1165_v49 = vadd.f32 %v1164_v44, %v942_v29  ;;  %v626_v50 = vpop.f32.mrb[2].mxu1 }
 0x142   : > { %952 = vst [vmem:[%s217_s21] sm:$0xff] %v1163_v46  ;;  %v1166_v51 = vadd.f32 %v626_v50, %v247_v47  ;;  %v628_v52 = vpop.f32.mrb[3].mxu1 }
 0x143   : > { %953 = vst [vmem:[%s217_s21 + $0x8] sm:$0xff] %v1165_v49  ;;  %v1168_v54 = vadd.f32 %v628_v52, %v247_v47 }
 0x144   : > { %v1167_v62 = vadd.f32 %v1166_v51, %v947_v45 }
 0x145   : > { %v1169_v63 = vadd.f32 %v1168_v54, %v949_v0 }
 0x146   : > { %954 = vst [vmem:[%s217_s21 + $0x10] sm:$0xf] %v1167_v62 }
 0x147   : > { %955 = vst [vmem:[%s217_s21 + $0x18] sm:$0xf] %v1169_v63 }
 0x148 PF: > { %s16_s17 = sadd.s32 1, %s1326_s17   ;;  %s1665_s12 = smov %s1310_s13 }
 0x149   : > { %p13_p9 = scmp.ge.s32.totalorder %s16_s17, 4   ;;  %s1666_s13 = smov %s1314_s14 }
 0x14a   : > { %s1667_s14 = smov %s1402_s24  ;;  %s1668_s15 = smov %s1322_s16 }
 0x14b   : > { %s1669_s16 = smov %s1671_s19  ;;  %15 = sbr.rel (!%p13_p9) target bundleno = 4 (0x4), region = 72 }
 0x152   :  { %986 = vsyncpa [#allocation3], 1 }
 0x153   :  { %988 = vsyncpa [#allocation3 + $0x1], 1 }

</bundles_post_ra>
